<compile_context>
chip_gen: v7x
topology: tpu7x:2x2x1
jax: 0.10.0
libtpu: 0.0.40
codegen_flags: <defaults>
</compile_context>

<pallas_src>
import functools
import math

import jax
import jax.numpy as jnp
from jax.experimental import pallas as pl
from jax.experimental.pallas import tpu as pltpu

LANES = 128


def _compute_grid_sizes(lims, grid_meters):
    return [int(round((lims[i][1] - lims[i][0]) / grid_meters[i])) for i in range(3)]


def _choose_tile_rows(rows, max_rows=64):
    """Sublane-rows of 128 points per grid step.  Must divide `rows` and be a
    multiple of 8 (or equal `rows`, which Pallas also accepts)."""
    if rows <= max_rows:
        return rows
    for st in range(max_rows - max_rows % 8, 7, -8):
        if rows % st == 0:
            return st
    return rows  # single tile over the whole point axis (always legal)


def _make_kernel(lims, grid_sizes, scales):
    x_lo, x_hi = float(lims[0][0]), float(lims[0][1])
    y_lo, y_hi = float(lims[1][0]), float(lims[1][1])
    z_lo, z_hi = float(lims[2][0]), float(lims[2][1])

    # Static per-scale sizes, matching torch's  grid_sizes.float() // scale.
    per_scale = []
    for s in scales:
        sx_f = float(grid_sizes[0]) // float(s)
        sy_f = float(grid_sizes[1]) // float(s)
        sz_f = float(grid_sizes[2]) // float(s)
        per_scale.append((sx_f, sy_f, sz_f, int(sx_f), int(sz_f)))

    def kernel(pc_ref, filt_ref, *scale_refs):
        # Dense (tile_rows, 128) channel slabs.
        x = pc_ref[0, 0, :, :]
        y = pc_ref[0, 1, :, :]
        z = pc_ref[0, 2, :, :]
        inten = pc_ref[0, 3, :, :]

        rho = jnp.sqrt(x * x + y * y)
        phi = jnp.arctan2(y, x) / math.pi * 180.0

        filt_ref[0, 0, :, :] = rho
        filt_ref[0, 1, :, :] = phi
        filt_ref[0, 2, :, :] = z
        filt_ref[0, 3, :, :] = inten

        # Hoisted normalization: same op order as the reference
        # ((data - lo) / (hi - lo), then * size per scale) => bit-exact.
        tx = (rho - x_lo) / (x_hi - x_lo)
        ty = (phi - y_lo) / (y_hi - y_lo)
        tz = (z - z_lo) / (z_hi - z_lo)

        for k, (sx_f, sy_f, sz_f, size_x, size_z) in enumerate(per_scale):
            out = scale_refs[k]

            xf = tx * sx_f
            yf = ty * sy_f
            zf = tz * sz_f
            xi = xf.astype(jnp.int32)   # trunc toward zero, like LongTensor cast
            yi = yf.astype(jnp.int32)
            zi = zf.astype(jnp.int32)
            xr = xf - xi.astype(jnp.float32)
            yr = yf - yi.astype(jnp.float32)
            zr = zf - zi.astype(jnp.float32)

            # NOTE: the reference clamps yidx with the X grid size ("size");
            # reproduced exactly.
            yi = jnp.clip(yi, 0, size_x - 1)

            lin = xi * size_x + yi                             # top-view linear idx
            lin2 = xi * (size_x * size_z) + yi * size_z + zi   # front-view linear idx

            out[0, 0, :, :] = xi
            out[0, 1, :, :] = yi
            out[0, 2, :, :] = zi
            out[0, 3, :, :] = lin
            out[0, 4, :, :] = lin2
            out[0, 5, :, :] = pltpu.bitcast(xr, jnp.int32)
            out[0, 6, :, :] = pltpu.bitcast(yr, jnp.int32)
            out[0, 7, :, :] = pltpu.bitcast(zr, jnp.int32)

    return kernel


@functools.lru_cache(maxsize=None)
def _build_forward(lims, grid_meters, scales, B, N, max_tile_rows):
    grid_sizes = _compute_grid_sizes(lims, grid_meters)
    kernel = _make_kernel(lims, grid_sizes, scales)

    rows = N // LANES
    st = _choose_tile_rows(rows, max_tile_rows)
    n_tiles = rows // st

    idx_map = lambda b, n: (b, 0, n, 0)
    in_spec = pl.BlockSpec((1, 4, st, LANES), idx_map)
    filt_spec = pl.BlockSpec((1, 4, st, LANES), idx_map)
    scale_spec = pl.BlockSpec((1, 8, st, LANES), idx_map)

    out_shapes = [jax.ShapeDtypeStruct((B, 4, rows, LANES), jnp.float32)]
    out_specs = [filt_spec]
    for _ in scales:
        out_shapes.append(jax.ShapeDtypeStruct((B, 8, rows, LANES), jnp.int32))
        out_specs.append(scale_spec)

    call = pl.pallas_call(
        kernel,
        out_shape=tuple(out_shapes),
        grid_spec=pltpu.PrefetchScalarGridSpec(
            num_scalar_prefetch=0,
            grid=(B, n_tiles),
            in_specs=[in_spec],
            out_specs=tuple(out_specs),
        ),
        compiler_params=pltpu.CompilerParams(
            dimension_semantics=("parallel", "parallel")),
    )

    def forward(pc):
        # (B, N, 4) -> (B, 4, N//128, 128).  The transpose is one HBM pass;
        # the trailing reshape is free.
        # TODO(synk): drop this transpose by transposing the small (tile, 4)
        # slab in-kernel once Mosaic's narrow-minor transpose lowering is
        # guaranteed on all generations.
        pc_t = jnp.transpose(pc[..., :4].astype(jnp.float32), (0, 2, 1))
        pc_t = pc_t.reshape(B, 4, rows, LANES)

        outs = call(pc_t)

        filt = outs[0].reshape(B, 4, N)
        filt_nl = jnp.transpose(filt, (0, 2, 1))            # (B, N, 4)
        pc_list = [filt_nl[b] for b in range(B)]

        view = {'top': {'idx': {}, 'coord': {}, 'res': {}},
                'front': {'idx': {}, 'coord': {}, 'res': {}}}
        for k, scale in enumerate(scales):
            p = outs[1 + k].reshape(B, 8, N)
            xi, yi, zi = p[:, 0], p[:, 1], p[:, 2]
            lin, lin2 = p[:, 3], p[:, 4]
            xr = jax.lax.bitcast_convert_type(p[:, 5], jnp.float32)
            yr = jax.lax.bitcast_convert_type(p[:, 6], jnp.float32)
            zr = jax.lax.bitcast_convert_type(p[:, 7], jnp.float32)

            top_coord = jnp.stack([xi, yi], axis=-1)         # (B, N, 2)
            front_coord = jnp.stack([xi, yi, zi], axis=-1)   # (B, N, 3)
            top_res = jnp.stack([xr, yr], axis=-1)           # (B, N, 2)
            front_res = jnp.stack([xr, zr], axis=-1)         # (B, N, 2)

            view['top']['idx'][scale] = [lin[b] for b in range(B)]
            view['top']['coord'][scale] = [top_coord[b] for b in range(B)]
            view['top']['res'][scale] = [top_res[b] for b in range(B)]
            view['front']['idx'][scale] = [lin2[b] for b in range(B)]
            view['front']['coord'][scale] = [front_coord[b] for b in range(B)]
            view['front']['res'][scale] = [front_res[b] for b in range(B)]
        return {'pc': pc_list, 'view_reprenstation': view}

    return jax.jit(forward)


def polar_preprocess_3d(pc, lims, grid_meters, scales=(0.5, 1.0), max_tile_rows=64):
    """pc: (B, N, >=4) float; N must be a multiple of 128.

    Returns the reference module's output structure.
    # TODO(synk): keep_mask / cls_label (data-dependent point compaction) of
    # the reference forward are not supported in the kernel path.
    """
    B, N, C = pc.shape
    assert C >= 4, "need at least x, y, z, intensity channels"
    assert N % LANES == 0, "point count must be a multiple of 128"
    lims_t = tuple(tuple(float(v) for v in l) for l in lims)
    gm_t = tuple(float(g) for g in grid_meters)
    fwd = _build_forward(lims_t, gm_t, tuple(float(s) for s in scales),
                         B, N, int(max_tile_rows))
    return fwd(pc)


if __name__ == "__main__":
    key = jax.random.PRNGKey(0)
    B, N = 2, 1024
    lims = [[0.0, 50.0], [-180.0, 180.0], [-3.0, 1.0]]
    grid_meters = [0.5, 1.0, 0.2]
    scales = (0.5, 1.0)

    kx, ky, kz, ki = jax.random.split(key, 4)
    x = jax.random.uniform(kx, (B, N), minval=-30.0, maxval=30.0)
    y = jax.random.uniform(ky, (B, N), minval=-30.0, maxval=30.0)
    z = jax.random.uniform(kz, (B, N), minval=-3.0, maxval=1.0)
    inten = jax.random.uniform(ki, (B, N), minval=0.0, maxval=1.0)
    pc = jnp.stack([x, y, z, inten], axis=-1).astype(jnp.float32)   # (B, N, 4)

    out = polar_preprocess_3d(pc, lims, grid_meters, scales=scales)
    jax.block_until_ready(out)
    print("KERNEL_OK")
</pallas_src>

<mosaic_0001>
module attributes {stable_mosaic.version = 11 : i64} {
  func.func @kernel(%arg0: i32, %arg1: i32, %arg2: memref<1x4x8x128xf32, #tpu.memory_space<vmem>>, %arg3: memref<1x4x8x128xf32, #tpu.memory_space<vmem>>, %arg4: memref<1x8x8x128xi32, #tpu.memory_space<vmem>>, %arg5: memref<1x8x8x128xi32, #tpu.memory_space<vmem>>) attributes {dimension_semantics = [#tpu.dimension_semantics<parallel>, #tpu.dimension_semantics<parallel>], iteration_bounds = array<i64: 2, 1>, scalar_prefetch = 0 : i64, scratch_operands = 0 : i64, tpu.core_type = #tpu.core_type<tc>, window_params = [{transform_indices = @transform_0, window_bounds = array<i64: 1, 4, 8, 128>}, {transform_indices = @transform_1, window_bounds = array<i64: 1, 4, 8, 128>}, {transform_indices = @transform_2, window_bounds = array<i64: 1, 8, 8, 128>}, {transform_indices = @transform_3, window_bounds = array<i64: 1, 8, 8, 128>}]} {
    %c0 = arith.constant 0 : index
    %c0_0 = arith.constant 0 : index
    %c0_1 = arith.constant 0 : index
    %c0_2 = arith.constant 0 : index
    %0 = vector.load %arg2[%c0, %c0_0, %c0_1, %c0_2] : memref<1x4x8x128xf32, #tpu.memory_space<vmem>>, vector<1x1x8x128xf32>
    %1 = vector.shape_cast %0 : vector<1x1x8x128xf32> to vector<8x128xf32>
    %c0_3 = arith.constant 0 : index
    %c1 = arith.constant 1 : index
    %c0_4 = arith.constant 0 : index
    %c0_5 = arith.constant 0 : index
    %2 = vector.load %arg2[%c0_3, %c1, %c0_4, %c0_5] : memref<1x4x8x128xf32, #tpu.memory_space<vmem>>, vector<1x1x8x128xf32>
    %3 = vector.shape_cast %2 : vector<1x1x8x128xf32> to vector<8x128xf32>
    %c0_6 = arith.constant 0 : index
    %c2 = arith.constant 2 : index
    %c0_7 = arith.constant 0 : index
    %c0_8 = arith.constant 0 : index
    %4 = vector.load %arg2[%c0_6, %c2, %c0_7, %c0_8] : memref<1x4x8x128xf32, #tpu.memory_space<vmem>>, vector<1x1x8x128xf32>
    %5 = vector.shape_cast %4 : vector<1x1x8x128xf32> to vector<8x128xf32>
    %c0_9 = arith.constant 0 : index
    %c3 = arith.constant 3 : index
    %c0_10 = arith.constant 0 : index
    %c0_11 = arith.constant 0 : index
    %6 = vector.load %arg2[%c0_9, %c3, %c0_10, %c0_11] : memref<1x4x8x128xf32, #tpu.memory_space<vmem>>, vector<1x1x8x128xf32>
    %7 = vector.shape_cast %6 : vector<1x1x8x128xf32> to vector<8x128xf32>
    %8 = arith.mulf %1, %1 : vector<8x128xf32>
    %9 = arith.mulf %3, %3 : vector<8x128xf32>
    %10 = arith.addf %8, %9 : vector<8x128xf32>
    %11 = math.sqrt %10 : vector<8x128xf32>
    %12 = math.atan2 %3, %1 : vector<8x128xf32>
    %cst = arith.constant 3.14159274 : f32
    %13 = vector.broadcast %cst : f32 to vector<8x128xf32>
    %14 = arith.divf %12, %13 : vector<8x128xf32>
    %cst_12 = arith.constant 1.800000e+02 : f32
    %15 = vector.broadcast %cst_12 : f32 to vector<8x128xf32>
    %16 = arith.mulf %14, %15 : vector<8x128xf32>
    %c0_13 = arith.constant 0 : index
    %c0_14 = arith.constant 0 : index
    %c0_15 = arith.constant 0 : index
    %c0_16 = arith.constant 0 : index
    %17 = vector.load %arg3[%c0_13, %c0_14, %c0_15, %c0_16] : memref<1x4x8x128xf32, #tpu.memory_space<vmem>>, vector<1x1x8x128xf32>
    %18 = vector.shape_cast %17 : vector<1x1x8x128xf32> to vector<8x128xf32>
    %19 = vector.shape_cast %11 : vector<8x128xf32> to vector<1x1x8x128xf32>
    tpu.vector_store %arg3[%c0_13, %c0_14, %c0_15, %c0_16], %19 {strides = array<i32>} : memref<1x4x8x128xf32, #tpu.memory_space<vmem>>, vector<1x1x8x128xf32>,
    %c0_17 = arith.constant 0 : index
    %c1_18 = arith.constant 1 : index
    %c0_19 = arith.constant 0 : index
    %c0_20 = arith.constant 0 : index
    %20 = vector.load %arg3[%c0_17, %c1_18, %c0_19, %c0_20] : memref<1x4x8x128xf32, #tpu.memory_space<vmem>>, vector<1x1x8x128xf32>
    %21 = vector.shape_cast %20 : vector<1x1x8x128xf32> to vector<8x128xf32>
    %22 = vector.shape_cast %16 : vector<8x128xf32> to vector<1x1x8x128xf32>
    tpu.vector_store %arg3[%c0_17, %c1_18, %c0_19, %c0_20], %22 {strides = array<i32>} : memref<1x4x8x128xf32, #tpu.memory_space<vmem>>, vector<1x1x8x128xf32>,
    %c0_21 = arith.constant 0 : index
    %c2_22 = arith.constant 2 : index
    %c0_23 = arith.constant 0 : index
    %c0_24 = arith.constant 0 : index
    %23 = vector.load %arg3[%c0_21, %c2_22, %c0_23, %c0_24] : memref<1x4x8x128xf32, #tpu.memory_space<vmem>>, vector<1x1x8x128xf32>
    %24 = vector.shape_cast %23 : vector<1x1x8x128xf32> to vector<8x128xf32>
    %25 = vector.shape_cast %5 : vector<8x128xf32> to vector<1x1x8x128xf32>
    tpu.vector_store %arg3[%c0_21, %c2_22, %c0_23, %c0_24], %25 {strides = array<i32>} : memref<1x4x8x128xf32, #tpu.memory_space<vmem>>, vector<1x1x8x128xf32>,
    %c0_25 = arith.constant 0 : index
    %c3_26 = arith.constant 3 : index
    %c0_27 = arith.constant 0 : index
    %c0_28 = arith.constant 0 : index
    %26 = vector.load %arg3[%c0_25, %c3_26, %c0_27, %c0_28] : memref<1x4x8x128xf32, #tpu.memory_space<vmem>>, vector<1x1x8x128xf32>
    %27 = vector.shape_cast %26 : vector<1x1x8x128xf32> to vector<8x128xf32>
    %28 = vector.shape_cast %7 : vector<8x128xf32> to vector<1x1x8x128xf32>
    tpu.vector_store %arg3[%c0_25, %c3_26, %c0_27, %c0_28], %28 {strides = array<i32>} : memref<1x4x8x128xf32, #tpu.memory_space<vmem>>, vector<1x1x8x128xf32>,
    %cst_29 = arith.constant 0.000000e+00 : f32
    %29 = vector.broadcast %cst_29 : f32 to vector<8x128xf32>
    %30 = arith.subf %11, %29 : vector<8x128xf32>
    %cst_30 = arith.constant 5.000000e+01 : f32
    %31 = vector.broadcast %cst_30 : f32 to vector<8x128xf32>
    %32 = arith.divf %30, %31 : vector<8x128xf32>
    %cst_31 = arith.constant -1.800000e+02 : f32
    %33 = vector.broadcast %cst_31 : f32 to vector<8x128xf32>
    %34 = arith.subf %16, %33 : vector<8x128xf32>
    %cst_32 = arith.constant 3.600000e+02 : f32
    %35 = vector.broadcast %cst_32 : f32 to vector<8x128xf32>
    %36 = arith.divf %34, %35 : vector<8x128xf32>
    %cst_33 = arith.constant -3.000000e+00 : f32
    %37 = vector.broadcast %cst_33 : f32 to vector<8x128xf32>
    %38 = arith.subf %5, %37 : vector<8x128xf32>
    %cst_34 = arith.constant 4.000000e+00 : f32
    %39 = vector.broadcast %cst_34 : f32 to vector<8x128xf32>
    %40 = arith.divf %38, %39 : vector<8x128xf32>
    %cst_35 = arith.constant 2.000000e+02 : f32
    %41 = vector.broadcast %cst_35 : f32 to vector<8x128xf32>
    %42 = arith.mulf %32, %41 : vector<8x128xf32>
    %cst_36 = arith.constant 7.200000e+02 : f32
    %43 = vector.broadcast %cst_36 : f32 to vector<8x128xf32>
    %44 = arith.mulf %36, %43 : vector<8x128xf32>
    %cst_37 = arith.constant 4.000000e+01 : f32
    %45 = vector.broadcast %cst_37 : f32 to vector<8x128xf32>
    %46 = arith.mulf %40, %45 : vector<8x128xf32>
    %47 = arith.fptosi %42 : vector<8x128xf32> to vector<8x128xi32>
    %48 = arith.fptosi %44 : vector<8x128xf32> to vector<8x128xi32>
    %49 = arith.fptosi %46 : vector<8x128xf32> to vector<8x128xi32>
    %50 = arith.sitofp %47 : vector<8x128xi32> to vector<8x128xf32>
    %51 = arith.subf %42, %50 : vector<8x128xf32>
    %52 = arith.sitofp %48 : vector<8x128xi32> to vector<8x128xf32>
    %53 = arith.subf %44, %52 : vector<8x128xf32>
    %54 = arith.sitofp %49 : vector<8x128xi32> to vector<8x128xf32>
    %55 = arith.subf %46, %54 : vector<8x128xf32>
    %c0_i32 = arith.constant 0 : i32
    %c199_i32 = arith.constant 199 : i32
    %56 = vector.broadcast %c0_i32 : i32 to vector<8x128xi32>
    %57 = arith.maxsi %56, %48 : vector<8x128xi32>
    %58 = vector.broadcast %c199_i32 : i32 to vector<8x128xi32>
    %59 = arith.minsi %58, %57 : vector<8x128xi32>
    %c200_i32 = arith.constant 200 : i32
    %60 = vector.broadcast %c200_i32 : i32 to vector<8x128xi32>
    %61 = arith.muli %47, %60 : vector<8x128xi32>
    %62 = arith.addi %61, %59 : vector<8x128xi32>
    %c8000_i32 = arith.constant 8000 : i32
    %63 = vector.broadcast %c8000_i32 : i32 to vector<8x128xi32>
    %64 = arith.muli %47, %63 : vector<8x128xi32>
    %c40_i32 = arith.constant 40 : i32
    %65 = vector.broadcast %c40_i32 : i32 to vector<8x128xi32>
    %66 = arith.muli %59, %65 : vector<8x128xi32>
    %67 = arith.addi %64, %66 : vector<8x128xi32>
    %68 = arith.addi %67, %49 : vector<8x128xi32>
    %c0_38 = arith.constant 0 : index
    %c0_39 = arith.constant 0 : index
    %c0_40 = arith.constant 0 : index
    %c0_41 = arith.constant 0 : index
    %69 = vector.load %arg4[%c0_38, %c0_39, %c0_40, %c0_41] : memref<1x8x8x128xi32, #tpu.memory_space<vmem>>, vector<1x1x8x128xi32>
    %70 = vector.shape_cast %69 : vector<1x1x8x128xi32> to vector<8x128xi32>
    %71 = vector.shape_cast %47 : vector<8x128xi32> to vector<1x1x8x128xi32>
    tpu.vector_store %arg4[%c0_38, %c0_39, %c0_40, %c0_41], %71 {strides = array<i32>} : memref<1x8x8x128xi32, #tpu.memory_space<vmem>>, vector<1x1x8x128xi32>,
    %c0_42 = arith.constant 0 : index
    %c1_43 = arith.constant 1 : index
    %c0_44 = arith.constant 0 : index
    %c0_45 = arith.constant 0 : index
    %72 = vector.load %arg4[%c0_42, %c1_43, %c0_44, %c0_45] : memref<1x8x8x128xi32, #tpu.memory_space<vmem>>, vector<1x1x8x128xi32>
    %73 = vector.shape_cast %72 : vector<1x1x8x128xi32> to vector<8x128xi32>
    %74 = vector.shape_cast %59 : vector<8x128xi32> to vector<1x1x8x128xi32>
    tpu.vector_store %arg4[%c0_42, %c1_43, %c0_44, %c0_45], %74 {strides = array<i32>} : memref<1x8x8x128xi32, #tpu.memory_space<vmem>>, vector<1x1x8x128xi32>,
    %c0_46 = arith.constant 0 : index
    %c2_47 = arith.constant 2 : index
    %c0_48 = arith.constant 0 : index
    %c0_49 = arith.constant 0 : index
    %75 = vector.load %arg4[%c0_46, %c2_47, %c0_48, %c0_49] : memref<1x8x8x128xi32, #tpu.memory_space<vmem>>, vector<1x1x8x128xi32>
    %76 = vector.shape_cast %75 : vector<1x1x8x128xi32> to vector<8x128xi32>
    %77 = vector.shape_cast %49 : vector<8x128xi32> to vector<1x1x8x128xi32>
    tpu.vector_store %arg4[%c0_46, %c2_47, %c0_48, %c0_49], %77 {strides = array<i32>} : memref<1x8x8x128xi32, #tpu.memory_space<vmem>>, vector<1x1x8x128xi32>,
    %c0_50 = arith.constant 0 : index
    %c3_51 = arith.constant 3 : index
    %c0_52 = arith.constant 0 : index
    %c0_53 = arith.constant 0 : index
    %78 = vector.load %arg4[%c0_50, %c3_51, %c0_52, %c0_53] : memref<1x8x8x128xi32, #tpu.memory_space<vmem>>, vector<1x1x8x128xi32>
    %79 = vector.shape_cast %78 : vector<1x1x8x128xi32> to vector<8x128xi32>
    %80 = vector.shape_cast %62 : vector<8x128xi32> to vector<1x1x8x128xi32>
    tpu.vector_store %arg4[%c0_50, %c3_51, %c0_52, %c0_53], %80 {strides = array<i32>} : memref<1x8x8x128xi32, #tpu.memory_space<vmem>>, vector<1x1x8x128xi32>,
    %c0_54 = arith.constant 0 : index
    %c4 = arith.constant 4 : index
    %c0_55 = arith.constant 0 : index
    %c0_56 = arith.constant 0 : index
    %81 = vector.load %arg4[%c0_54, %c4, %c0_55, %c0_56] : memref<1x8x8x128xi32, #tpu.memory_space<vmem>>, vector<1x1x8x128xi32>
    %82 = vector.shape_cast %81 : vector<1x1x8x128xi32> to vector<8x128xi32>
    %83 = vector.shape_cast %68 : vector<8x128xi32> to vector<1x1x8x128xi32>
    tpu.vector_store %arg4[%c0_54, %c4, %c0_55, %c0_56], %83 {strides = array<i32>} : memref<1x8x8x128xi32, #tpu.memory_space<vmem>>, vector<1x1x8x128xi32>,
    %84 = tpu.bitcast %51 : vector<8x128xf32> -> vector<8x128xi32>
    %c0_57 = arith.constant 0 : index
    %c5 = arith.constant 5 : index
    %c0_58 = arith.constant 0 : index
    %c0_59 = arith.constant 0 : index
    %85 = vector.load %arg4[%c0_57, %c5, %c0_58, %c0_59] : memref<1x8x8x128xi32, #tpu.memory_space<vmem>>, vector<1x1x8x128xi32>
    %86 = vector.shape_cast %85 : vector<1x1x8x128xi32> to vector<8x128xi32>
    %87 = vector.shape_cast %84 : vector<8x128xi32> to vector<1x1x8x128xi32>
    tpu.vector_store %arg4[%c0_57, %c5, %c0_58, %c0_59], %87 {strides = array<i32>} : memref<1x8x8x128xi32, #tpu.memory_space<vmem>>, vector<1x1x8x128xi32>,
    %88 = tpu.bitcast %53 : vector<8x128xf32> -> vector<8x128xi32>
    %c0_60 = arith.constant 0 : index
    %c6 = arith.constant 6 : index
    %c0_61 = arith.constant 0 : index
    %c0_62 = arith.constant 0 : index
    %89 = vector.load %arg4[%c0_60, %c6, %c0_61, %c0_62] : memref<1x8x8x128xi32, #tpu.memory_space<vmem>>, vector<1x1x8x128xi32>
    %90 = vector.shape_cast %89 : vector<1x1x8x128xi32> to vector<8x128xi32>
    %91 = vector.shape_cast %88 : vector<8x128xi32> to vector<1x1x8x128xi32>
    tpu.vector_store %arg4[%c0_60, %c6, %c0_61, %c0_62], %91 {strides = array<i32>} : memref<1x8x8x128xi32, #tpu.memory_space<vmem>>, vector<1x1x8x128xi32>,
    %92 = tpu.bitcast %55 : vector<8x128xf32> -> vector<8x128xi32>
    %c0_63 = arith.constant 0 : index
    %c7 = arith.constant 7 : index
    %c0_64 = arith.constant 0 : index
    %c0_65 = arith.constant 0 : index
    %93 = vector.load %arg4[%c0_63, %c7, %c0_64, %c0_65] : memref<1x8x8x128xi32, #tpu.memory_space<vmem>>, vector<1x1x8x128xi32>
    %94 = vector.shape_cast %93 : vector<1x1x8x128xi32> to vector<8x128xi32>
    %95 = vector.shape_cast %92 : vector<8x128xi32> to vector<1x1x8x128xi32>
    tpu.vector_store %arg4[%c0_63, %c7, %c0_64, %c0_65], %95 {strides = array<i32>} : memref<1x8x8x128xi32, #tpu.memory_space<vmem>>, vector<1x1x8x128xi32>,
    %cst_66 = arith.constant 1.000000e+02 : f32
    %96 = vector.broadcast %cst_66 : f32 to vector<8x128xf32>
    %97 = arith.mulf %32, %96 : vector<8x128xf32>
    %cst_67 = arith.constant 3.600000e+02 : f32
    %98 = vector.broadcast %cst_67 : f32 to vector<8x128xf32>
    %99 = arith.mulf %36, %98 : vector<8x128xf32>
    %cst_68 = arith.constant 2.000000e+01 : f32
    %100 = vector.broadcast %cst_68 : f32 to vector<8x128xf32>
    %101 = arith.mulf %40, %100 : vector<8x128xf32>
    %102 = arith.fptosi %97 : vector<8x128xf32> to vector<8x128xi32>
    %103 = arith.fptosi %99 : vector<8x128xf32> to vector<8x128xi32>
    %104 = arith.fptosi %101 : vector<8x128xf32> to vector<8x128xi32>
    %105 = arith.sitofp %102 : vector<8x128xi32> to vector<8x128xf32>
    %106 = arith.subf %97, %105 : vector<8x128xf32>
    %107 = arith.sitofp %103 : vector<8x128xi32> to vector<8x128xf32>
    %108 = arith.subf %99, %107 : vector<8x128xf32>
    %109 = arith.sitofp %104 : vector<8x128xi32> to vector<8x128xf32>
    %110 = arith.subf %101, %109 : vector<8x128xf32>
    %c0_i32_69 = arith.constant 0 : i32
    %c99_i32 = arith.constant 99 : i32
    %111 = vector.broadcast %c0_i32_69 : i32 to vector<8x128xi32>
    %112 = arith.maxsi %111, %103 : vector<8x128xi32>
    %113 = vector.broadcast %c99_i32 : i32 to vector<8x128xi32>
    %114 = arith.minsi %113, %112 : vector<8x128xi32>
    %c100_i32 = arith.constant 100 : i32
    %115 = vector.broadcast %c100_i32 : i32 to vector<8x128xi32>
    %116 = arith.muli %102, %115 : vector<8x128xi32>
    %117 = arith.addi %116, %114 : vector<8x128xi32>
    %c2000_i32 = arith.constant 2000 : i32
    %118 = vector.broadcast %c2000_i32 : i32 to vector<8x128xi32>
    %119 = arith.muli %102, %118 : vector<8x128xi32>
    %c20_i32 = arith.constant 20 : i32
    %120 = vector.broadcast %c20_i32 : i32 to vector<8x128xi32>
    %121 = arith.muli %114, %120 : vector<8x128xi32>
    %122 = arith.addi %119, %121 : vector<8x128xi32>
    %123 = arith.addi %122, %104 : vector<8x128xi32>
    %c0_70 = arith.constant 0 : index
    %c0_71 = arith.constant 0 : index
    %c0_72 = arith.constant 0 : index
    %c0_73 = arith.constant 0 : index
    %124 = vector.load %arg5[%c0_70, %c0_71, %c0_72, %c0_73] : memref<1x8x8x128xi32, #tpu.memory_space<vmem>>, vector<1x1x8x128xi32>
    %125 = vector.shape_cast %124 : vector<1x1x8x128xi32> to vector<8x128xi32>
    %126 = vector.shape_cast %102 : vector<8x128xi32> to vector<1x1x8x128xi32>
    tpu.vector_store %arg5[%c0_70, %c0_71, %c0_72, %c0_73], %126 {strides = array<i32>} : memref<1x8x8x128xi32, #tpu.memory_space<vmem>>, vector<1x1x8x128xi32>,
    %c0_74 = arith.constant 0 : index
    %c1_75 = arith.constant 1 : index
    %c0_76 = arith.constant 0 : index
    %c0_77 = arith.constant 0 : index
    %127 = vector.load %arg5[%c0_74, %c1_75, %c0_76, %c0_77] : memref<1x8x8x128xi32, #tpu.memory_space<vmem>>, vector<1x1x8x128xi32>
    %128 = vector.shape_cast %127 : vector<1x1x8x128xi32> to vector<8x128xi32>
    %129 = vector.shape_cast %114 : vector<8x128xi32> to vector<1x1x8x128xi32>
    tpu.vector_store %arg5[%c0_74, %c1_75, %c0_76, %c0_77], %129 {strides = array<i32>} : memref<1x8x8x128xi32, #tpu.memory_space<vmem>>, vector<1x1x8x128xi32>,
    %c0_78 = arith.constant 0 : index
    %c2_79 = arith.constant 2 : index
    %c0_80 = arith.constant 0 : index
    %c0_81 = arith.constant 0 : index
    %130 = vector.load %arg5[%c0_78, %c2_79, %c0_80, %c0_81] : memref<1x8x8x128xi32, #tpu.memory_space<vmem>>, vector<1x1x8x128xi32>
    %131 = vector.shape_cast %130 : vector<1x1x8x128xi32> to vector<8x128xi32>
    %132 = vector.shape_cast %104 : vector<8x128xi32> to vector<1x1x8x128xi32>
    tpu.vector_store %arg5[%c0_78, %c2_79, %c0_80, %c0_81], %132 {strides = array<i32>} : memref<1x8x8x128xi32, #tpu.memory_space<vmem>>, vector<1x1x8x128xi32>,
    %c0_82 = arith.constant 0 : index
    %c3_83 = arith.constant 3 : index
    %c0_84 = arith.constant 0 : index
    %c0_85 = arith.constant 0 : index
    %133 = vector.load %arg5[%c0_82, %c3_83, %c0_84, %c0_85] : memref<1x8x8x128xi32, #tpu.memory_space<vmem>>, vector<1x1x8x128xi32>
    %134 = vector.shape_cast %133 : vector<1x1x8x128xi32> to vector<8x128xi32>
    %135 = vector.shape_cast %117 : vector<8x128xi32> to vector<1x1x8x128xi32>
    tpu.vector_store %arg5[%c0_82, %c3_83, %c0_84, %c0_85], %135 {strides = array<i32>} : memref<1x8x8x128xi32, #tpu.memory_space<vmem>>, vector<1x1x8x128xi32>,
    %c0_86 = arith.constant 0 : index
    %c4_87 = arith.constant 4 : index
    %c0_88 = arith.constant 0 : index
    %c0_89 = arith.constant 0 : index
    %136 = vector.load %arg5[%c0_86, %c4_87, %c0_88, %c0_89] : memref<1x8x8x128xi32, #tpu.memory_space<vmem>>, vector<1x1x8x128xi32>
    %137 = vector.shape_cast %136 : vector<1x1x8x128xi32> to vector<8x128xi32>
    %138 = vector.shape_cast %123 : vector<8x128xi32> to vector<1x1x8x128xi32>
    tpu.vector_store %arg5[%c0_86, %c4_87, %c0_88, %c0_89], %138 {strides = array<i32>} : memref<1x8x8x128xi32, #tpu.memory_space<vmem>>, vector<1x1x8x128xi32>,
    %139 = tpu.bitcast %106 : vector<8x128xf32> -> vector<8x128xi32>
    %c0_90 = arith.constant 0 : index
    %c5_91 = arith.constant 5 : index
    %c0_92 = arith.constant 0 : index
    %c0_93 = arith.constant 0 : index
    %140 = vector.load %arg5[%c0_90, %c5_91, %c0_92, %c0_93] : memref<1x8x8x128xi32, #tpu.memory_space<vmem>>, vector<1x1x8x128xi32>
    %141 = vector.shape_cast %140 : vector<1x1x8x128xi32> to vector<8x128xi32>
    %142 = vector.shape_cast %139 : vector<8x128xi32> to vector<1x1x8x128xi32>
    tpu.vector_store %arg5[%c0_90, %c5_91, %c0_92, %c0_93], %142 {strides = array<i32>} : memref<1x8x8x128xi32, #tpu.memory_space<vmem>>, vector<1x1x8x128xi32>,
    %143 = tpu.bitcast %108 : vector<8x128xf32> -> vector<8x128xi32>
    %c0_94 = arith.constant 0 : index
    %c6_95 = arith.constant 6 : index
    %c0_96 = arith.constant 0 : index
    %c0_97 = arith.constant 0 : index
    %144 = vector.load %arg5[%c0_94, %c6_95, %c0_96, %c0_97] : memref<1x8x8x128xi32, #tpu.memory_space<vmem>>, vector<1x1x8x128xi32>
    %145 = vector.shape_cast %144 : vector<1x1x8x128xi32> to vector<8x128xi32>
    %146 = vector.shape_cast %143 : vector<8x128xi32> to vector<1x1x8x128xi32>
    tpu.vector_store %arg5[%c0_94, %c6_95, %c0_96, %c0_97], %146 {strides = array<i32>} : memref<1x8x8x128xi32, #tpu.memory_space<vmem>>, vector<1x1x8x128xi32>,
    %147 = tpu.bitcast %110 : vector<8x128xf32> -> vector<8x128xi32>
    %c0_98 = arith.constant 0 : index
    %c7_99 = arith.constant 7 : index
    %c0_100 = arith.constant 0 : index
    %c0_101 = arith.constant 0 : index
    %148 = vector.load %arg5[%c0_98, %c7_99, %c0_100, %c0_101] : memref<1x8x8x128xi32, #tpu.memory_space<vmem>>, vector<1x1x8x128xi32>
    %149 = vector.shape_cast %148 : vector<1x1x8x128xi32> to vector<8x128xi32>
    %150 = vector.shape_cast %147 : vector<8x128xi32> to vector<1x1x8x128xi32>
    tpu.vector_store %arg5[%c0_98, %c7_99, %c0_100, %c0_101], %150 {strides = array<i32>} : memref<1x8x8x128xi32, #tpu.memory_space<vmem>>, vector<1x1x8x128xi32>,
    return
  }
  func.func @transform_0(%arg0: i32, %arg1: i32) -> (i32, i32, i32, i32) {
    %c0_i32 = arith.constant 0 : i32
    %c0_i32_0 = arith.constant 0 : i32
    %c0_i32_1 = arith.constant 0 : i32
    return %arg0, %c0_i32, %arg1, %c0_i32_0 : i32, i32, i32, i32
  }
  func.func @transform_1(%arg0: i32, %arg1: i32) -> (i32, i32, i32, i32) {
    %c0_i32 = arith.constant 0 : i32
    %c0_i32_0 = arith.constant 0 : i32
    %c0_i32_1 = arith.constant 0 : i32
    return %arg0, %c0_i32, %arg1, %c0_i32_0 : i32, i32, i32, i32
  }
  func.func @transform_2(%arg0: i32, %arg1: i32) -> (i32, i32, i32, i32) {
    %c0_i32 = arith.constant 0 : i32
    %c0_i32_0 = arith.constant 0 : i32
    %c0_i32_1 = arith.constant 0 : i32
    return %arg0, %c0_i32, %arg1, %c0_i32_0 : i32, i32, i32, i32
  }
  func.func @transform_3(%arg0: i32, %arg1: i32) -> (i32, i32, i32, i32) {
    %c0_i32 = arith.constant 0 : i32
    %c0_i32_0 = arith.constant 0 : i32
    %c0_i32_1 = arith.constant 0 : i32
    return %arg0, %c0_i32, %arg1, %c0_i32_0 : i32, i32, i32, i32
  }
}

</mosaic_0001>

<bundles_post_ra>
// kernel: forward.1
= control target key start
LH: loop header
LB: loop body
LE: loop exit
PB: predicated region body
PF: predicated region fallthrough
CT: control target
= control target key end

     0   :  { %s711_s12 = smov 0   ;;  %s713_s13 = smov 0   ;;  %s828_s0 = inlined_call_operand.vmem [shape: f32[2,4,8,128], index: 0, kind: input, shape index: {}]   ;;  %s829_s1 = inlined_call_operand.vmem [shape: f32[2,4,8,128], index: 1, kind: output, shape index: {0}]   ;;  %s830_s2 = inlined_call_operand.vmem [shape: s32[2,8,8,128], index: 2, kind: output, shape index: {1}]   ;;  %s831_s3 = inlined_call_operand.vmem [shape: s32[2,8,8,128], index: 3, kind: output, shape index: {2}]  }
   0x1   :  { %s715_s14 = smov 0  }
   0x2 LB: > { %s26_s15 = sadd.s32 1, %s683_s13  ;;  %p586_p0 = scmp.ge.s32.totalorder %s687_s14, 1  ;;  %s687_s14 = sphi %s715_s14, %s14_s14   ;;  %s683_s13 = sphi %s713_s13, %s833_s13   ;;  %s679_s12 = sphi %s711_s12, %s832_s12  }
   0x3   : > { %p28_p1 = scmp.ge.s32.totalorder %s26_s15, 2  ;;  %p165_p2 = scmp.lt.s32.totalorder %s687_s14, 3 }
   0x5   : > { %s835_s15 = smov (%p28_p1, %s26_s15), 0  ;;  %p166_p3 = pnand %p586_p0, %p165_p2 }
   0x6   : > { %p211_p4 = scmp.lt.s32.totalorder (!%p166_p3), %s679_s12, 1  ;;  %v689_v62 = vmov (!%p166_p3), 0.0  }
   0x7   : > { %169 = sbr.rel (%p166_p3) target bundleno = 110 (0x6e), region = 24 }
   0xe   : > { %s837_s12 = smov (!%p211_p4, %s679_s12), 1 }
   0xf   : > { %s619_s16 = sshll.u32 %s837_s12, 5  ;;  %s621_s23 = sshll.u32 %s837_s12, 6 }
  0x10   : > { %s218_s19 = scalar_lea.vmem %s828_s0, %s619_s16  ;;  %s735_s22 = scalar_lea.vmem %s829_s1, %s619_s16 }
  0x11   : > { %v737_v0 = vld [vmem:[%s218_s19] sm:$0xff]  ;;  %v739_v1 = vld [vmem:[%s218_s19 + $0x8] sm:$0xff]  ;;  %v596_v2 = vld [vmem:[%s218_s19 + $0x10] sm:$0xff]  ;;  %s758_s26 = scalar_lea.vmem %s830_s2, %s621_s23  ;;  %s763_s29 = scalar_lea.vmem %s831_s3, %s621_s23 }
  0x12   : > { %v250_v3 = vmul.f32 %v737_v0, %v737_v0  ;;  %v251_v4 = vmul.f32 %v739_v1, %v739_v1  ;;  %v746_v5 = vand.u32 2147483647, %v737_v0  ;;  %v749_v6 = vand.u32 2147483647, %v739_v1  ;;  %599 = vst [vmem:[%s735_s22 + $0x10] sm:$0xff] %v596_v2  ;;  %v597_v7 = vld [vmem:[%s218_s19 + $0x18] sm:$0xff] }
  0x13   : > { %600 = vst [vmem:[%s735_s22 + $0x18] sm:$0xff] %v597_v7  ;;  %v602_v10 = vadd.f32 3.0, %v596_v2  ;;  %vm290_vm3 = vcmp.lt.s32.totalorder %v737_v0, 0  ;;  %vm294_vm4 = vcmp.ne.f32.partialorder %v737_v0, %v737_v0  ;;  %vm295_vm5 = vcmp.ne.f32.partialorder %v739_v1, %v739_v1 }
  0x14   : > { %v252_v8 = vadd.f32 %v251_v4, %v250_v3  ;;  %v263_v9 = vmax.f32 %v746_v5, %v749_v6  ;;  %v262_v16 = vmin.f32 %v746_v5, %v749_v6  ;;  %vm284_vm2 = vcmp.gt.f32.partialorder %v749_v6, %v746_v5  ;;  %vm296_vm10 = vmor %vm294_vm4, %vm295_vm5 }
  0x15   : > { %v324_v11 = vmul.f32 0.25, %v602_v10  ;;  %vm287_vm6 = vcmp.lt.f32.partialorder %v737_v0, 0.0  ;;  %vm300_vm7 = vcmp.eq.s32.totalorder %v746_v5, inf  ;;  %vm301_vm8 = vcmp.eq.s32.totalorder %v749_v6, inf }
  0x16   : > { %661 = vrsqrt.f32 %v252_v8  ;;  %vm255_vm0 = vcmp.eq.f32.partialorder %v252_v8, inf  ;;  %v258_v20 = vand.u32 2147483648, %v252_v8  ;;  %vm257_vm1 = vcmp.eq.f32.partialorder %v252_v8, 0.0  ;;  %vm302_vm11 = vmand %vm300_vm7, %vm301_vm8 }
  0x17   : > { %663 = vrcp.f32 %v263_v9  ;;  %v327_v12 = vmul.f32 40.0, %v324_v11  ;;  %v367_v13 = vmul.f32 20.0, %v324_v11  ;;  %v291_v63 = vsel %vm290_vm3, 3.1415927, %v689_v62 }
  0x18   : > { %vm292_vm9 = vcmp.eq.f32.partialorder %v739_v1, 0.0  ;;  %v690_v3 = vmov 0.7853982   ;;  %v305_v9 = vand.u32 2147483648, %v739_v1 }
  0x19   : > { %v627_v14 = vtrunc.f32 %v327_v12  ;;  %v633_v15 = vtrunc.f32 %v367_v13  ;;  %v299_v4 = vsel %vm287_vm6, 2.3561945, %v690_v3 }
  0x1b   : > { %v767_v17 = vcvt.f32.s32 %v627_v14  ;;  %v769_v18 = vcvt.f32.s32 %v633_v15 }
  0x1d   : > { %604 = vst [vmem:[%s758_s26 + $0x10] sm:$0xff] %v767_v17  ;;  %v335_v23 = vcvt.s32.f32 %v767_v17  ;;  %611 = vst [vmem:[%s763_s29 + $0x10] sm:$0xff] %v769_v18  ;;  %v375_v24 = vcvt.s32.f32 %v769_v18 }
  0x1f   : > { %v336_v27 = vsub.f32 %v327_v12, %v335_v23  ;;  %v376_v28 = vsub.f32 %v367_v13, %v375_v24 }
  0x20   : > { %v662_v19 = vpop.eup %661 }
  0x21   : > { %v664_v21 = vpop.eup %663  ;;  %v254_v22 = vmul.f32 %v662_v19, %v252_v8  ;;  %609 = vst [vmem:[%s758_s26 + $0x38] sm:$0xff] %v336_v27  ;;  %616 = vst [vmem:[%s763_s29 + $0x38] sm:$0xff] %v376_v28 }
  0x22   : > { %v265_v25 = vmul.f32 %v664_v21, %v262_v16 }
  0x23   : > { %v256_v26 = vsel %vm255_vm0, %v252_v8, %v254_v22 }
  0x24   : > { %v259_v29 = vsel %vm257_vm1, %v258_v20, %v256_v26  ;;  %v266_v30 = vmul.f32 %v265_v25, %v265_v25 }
  0x25   : > { %310 = vst [vmem:[%s735_s22] sm:$0xff] %v259_v29  ;;  %v318_v31 = vmul.f32 0.02, %v259_v29 }
  0x26   : > { %v267_v32 = vmul.f32 0.002785687, %v266_v30 }
  0x27   : > { %v325_v33 = vmul.f32 200.0, %v318_v31  ;;  %v365_v34 = vmul.f32 100.0, %v318_v31 }
  0x28   : > { %v268_v35 = vadd.f32 -0.015866, %v267_v32 }
  0x29   : > { %v623_v36 = vtrunc.f32 %v325_v33  ;;  %v629_v37 = vtrunc.f32 %v365_v34 }
  0x2a   : > { %v269_v38 = vmul.f32 %v268_v35, %v266_v30 }
  0x2b   : > { %v780_v39 = vcvt.f32.s32 %v623_v36  ;;  %v782_v40 = vcvt.f32.s32 %v629_v37 }
  0x2c   : > { %v270_v41 = vadd.f32 0.04247222, %v269_v38 }
  0x2d   : > { %347 = vst [vmem:[%s758_s26] sm:$0xff] %v780_v39  ;;  %387 = vst [vmem:[%s763_s29] sm:$0xff] %v782_v40  ;;  %v331_v42 = vcvt.s32.f32 %v780_v39  ;;  %v371_v43 = vcvt.s32.f32 %v782_v40  ;;  %v341_v22 = vmul.u32 200, %v780_v39  ;;  %v381_v23 = vmul.u32 100, %v782_v40 }
  0x2e   : > { %v271_v44 = vmul.f32 %v270_v41, %v266_v30  ;;  %v343_v26 = vmul.u32 8000, %v780_v39  ;;  %v383_v28 = vmul.u32 2000, %v782_v40 }
  0x2f   : > { %v332_v45 = vsub.f32 %v325_v33, %v331_v42  ;;  %v372_v46 = vsub.f32 %v365_v34, %v371_v43 }
  0x30   : > { %v272_v47 = vadd.f32 -0.074975304, %v271_v44 }
  0x31   : > { %607 = vst [vmem:[%s758_s26 + $0x28] sm:$0xff] %v332_v45  ;;  %614 = vst [vmem:[%s763_s29 + $0x28] sm:$0xff] %v372_v46 }
  0x32   : > { %v273_v48 = vmul.f32 %v272_v47, %v266_v30 }
  0x34   : > { %v274_v49 = vadd.f32 0.1064488, %v273_v48 }
  0x36   : > { %v275_v50 = vmul.f32 %v274_v49, %v266_v30 }
  0x38   : > { %v276_v51 = vadd.f32 -0.14207031, %v275_v50 }
  0x3a   : > { %v277_v52 = vmul.f32 %v276_v51, %v266_v30 }
  0x3c   : > { %v278_v53 = vadd.f32 0.19993454, %v277_v52 }
  0x3e   : > { %v279_v54 = vmul.f32 %v278_v53, %v266_v30 }
  0x40   : > { %v280_v55 = vadd.f32 -0.33333147, %v279_v54 }
  0x42   : > { %v281_v56 = vmul.f32 %v280_v55, %v266_v30 }
  0x44   : > { %v282_v57 = vmul.f32 %v281_v56, %v265_v25 }
  0x46   : > { %v283_v58 = vadd.f32 %v282_v57, %v265_v25 }
  0x48   : > { %v285_v59 = vsub.f32 1.5707964, %v283_v58 }
  0x4a   : > { %v286_v60 = vsel %vm284_vm2, %v285_v59, %v283_v58 }
  0x4b   : > { %v288_v61 = vsub.f32 3.1415927, %v286_v60 }
  0x4d   : > { %v289_v2 = vsel %vm287_vm6, %v288_v61, %v286_v60 }
  0x4e   : > { %v293_v7 = vsel %vm292_vm9, %v291_v63, %v289_v2 }
  0x4f   : > { %v297_v8 = vsel %vm296_vm10, nan, %v293_v7 }
  0x50   : > { %v303_v0 = vsel %vm302_vm11, %v299_v4, %v297_v8 }
  0x51   : > { %v304_v10 = vand.u32 2147483647, %v303_v0 }
  0x53   : > { %v306_v5 = vor.u32 %v305_v9, %v304_v10 }
  0x55   : > { %v308_v11 = vmul.f32 0.31830987, %v306_v5 }
  0x57   : > { %v309_v6 = vmul.f32 180.0, %v308_v11 }
  0x59   : > { %598 = vst [vmem:[%s735_s22 + $0x8] sm:$0xff] %v309_v6  ;;  %v601_v12 = vadd.f32 180.0, %v309_v6 }
  0x5b   : > { %v321_v13 = vmul.f32 0.0027777778, %v601_v12 }
  0x5d   : > { %v326_v14 = vmul.f32 720.0, %v321_v13  ;;  %v366_v15 = vmul.f32 360.0, %v321_v13 }
  0x5f   : > { %v625_v16 = vtrunc.f32 %v326_v14  ;;  %v631_v19 = vtrunc.f32 %v366_v15 }
  0x61   : > { %v626_v20 = vcvt.f32.s32 %v625_v16  ;;  %v632_v21 = vcvt.f32.s32 %v631_v19 }
  0x63   : > { %vm337_vm12 = vcmp.gt.s32.totalorder %v626_v20, 0  ;;  %v333_v1 = vcvt.s32.f32 %v626_v20  ;;  %vm377_vm13 = vcmp.gt.s32.totalorder %v632_v21, 0  ;;  %v373_v24 = vcvt.s32.f32 %v632_v21 }
  0x64   : > { %v338_v25 = vsel %vm337_vm12, %v626_v20, 0  ;;  %v378_v27 = vsel %vm377_vm13, %v632_v21, 0 }
  0x65   : > { %vm339_vm14 = vcmp.lt.s32.totalorder %v338_v25, 199  ;;  %v334_v29 = vsub.f32 %v326_v14, %v333_v1  ;;  %vm379_vm15 = vcmp.lt.s32.totalorder %v378_v27, 99  ;;  %v374_v30 = vsub.f32 %v366_v15, %v373_v24 }
  0x66   : > { %v340_v31 = vsel %vm339_vm14, %v338_v25, 199  ;;  %v380_v32 = vsel %vm379_vm15, %v378_v27, 99 }
  0x67   : > { %v344_v33 = vmul.u32 40, %v340_v31  ;;  %603 = vst [vmem:[%s758_s26 + $0x8] sm:$0xff] %v340_v31  ;;  %v342_v34 = vadd.s32 %v341_v22, %v340_v31  ;;  %608 = vst [vmem:[%s758_s26 + $0x30] sm:$0xff] %v334_v29  ;;  %v384_v35 = vmul.u32 20, %v380_v32  ;;  %v382_v36 = vadd.s32 %v381_v23, %v380_v32 }
  0x68   : > { %610 = vst [vmem:[%s763_s29 + $0x8] sm:$0xff] %v380_v32  ;;  %615 = vst [vmem:[%s763_s29 + $0x30] sm:$0xff] %v374_v30 }
  0x69   : > { %605 = vst [vmem:[%s758_s26 + $0x18] sm:$0xff] %v342_v34  ;;  %v345_v37 = vadd.s32 %v344_v33, %v343_v26  ;;  %612 = vst [vmem:[%s763_s29 + $0x18] sm:$0xff] %v382_v36  ;;  %v385_v38 = vadd.s32 %v384_v35, %v383_v28 }
  0x6b   : > { %v346_v39 = vadd.s32 %v767_v17, %v345_v37  ;;  %v386_v40 = vadd.s32 %v769_v18, %v385_v38 }
  0x6d   : > { %606 = vst [vmem:[%s758_s26 + $0x20] sm:$0xff] %v346_v39  ;;  %613 = vst [vmem:[%s763_s29 + $0x20] sm:$0xff] %v386_v40 }
  0x6e PF: > { %s14_s14 = sadd.s32 1, %s687_s14   ;;  %s832_s12 = smov %s683_s13 }
  0x6f   : > { %p11_p5 = scmp.ge.s32.totalorder %s14_s14, 4   ;;  %s833_s13 = smov %s835_s15 }
  0x71   :  { %13 = sbr.rel (!%p11_p5) target bundleno = 2 (0x2), region = 98 }

</bundles_post_ra>
